<compile_context>
chip_gen: v7x
topology: tpu7x:2x2x1
jax: 0.10.0
libtpu: 0.0.40
codegen_flags: <defaults>
</compile_context>

<pallas_src>
import numpy as np

import jax
import jax.numpy as jnp
from jax.experimental import pallas as pl
from jax.experimental.pallas import tpu as pltpu


def _mlp_kernel(x_ref, w1_ref, b1_ref, w2_ref, b2_ref, o_ref):
    # x_ref : (tm, H) bf16      w1_ref: (H, I) bf16    b1_ref: (1, I) f32
    # w2_ref: (I, H) bf16       b2_ref: (1, H) f32     o_ref : (tm, H) f32
    x = x_ref[...]

    # fc1 (bf16 operands, f32 accumulate) + bias in f32
    h = jnp.dot(x, w1_ref[...], preferred_element_type=jnp.float32) + b1_ref[...]

    # GELU, tanh approximation (matches torch approximate='tanh'); kept in f32
    # so the same kernel is accurate on v5e (no bf16 VPU/EUP) as well.
    c = 0.7978845608028654  # sqrt(2/pi)
    h = 0.5 * h * (1.0 + jnp.tanh(c * (h + 0.044715 * (h * h * h))))

    # fc2 (bf16 operands, f32 accumulate) + bias in f32
    o = jnp.dot(h.astype(w2_ref.dtype), w2_ref[...],
                preferred_element_type=jnp.float32) + b2_ref[...]
    o_ref[...] = o.astype(o_ref.dtype)


def _round_up(x, m):
    return ((x + m - 1) // m) * m


def siglip_mlp(x, w1, b1, w2, b2, *, tm=256, compute_dtype=jnp.bfloat16):
    """x: (B, S, H). w1: (H, I), b1: (I,), w2: (I, H), b2: (H,).

    Returns (B, S, H) in x.dtype. Wrap in jax.jit at the call site for reuse.
    """
    B, S, H = x.shape
    I = w1.shape[1]
    M = B * S

    # Token tiling: no divisibility requirement -- clamp the tile for tiny
    # inputs and pad M up to a multiple of the tile otherwise.
    tm_eff = min(tm, _round_up(M, 8))
    Mp = _round_up(M, tm_eff)
    grid = (Mp // tm_eff,)

    x2d = x.reshape(M, H).astype(compute_dtype)
    if Mp != M:
        x2d = jnp.pad(x2d, ((0, Mp - M), (0, 0)))

    w1c = w1.astype(compute_dtype)
    w2c = w2.astype(compute_dtype)
    b1_2d = b1.reshape(1, I).astype(jnp.float32)
    b2_2d = b2.reshape(1, H).astype(jnp.float32)

    out_itemsize = np.dtype(x.dtype).itemsize
    c_itemsize = np.dtype(compute_dtype).itemsize

    # VMEM budget: single-buffered bf16 weights + biases, double-buffered
    # activation tiles, f32 (tm, I) intermediate, plus slack.
    vmem_bytes = (
        (H * I + I * H) * c_itemsize          # weights (single-buffered)
        + (I + H) * 4                         # biases
        + 2 * tm_eff * H * c_itemsize         # x tiles (double-buffered)
        + 2 * tm_eff * H * out_itemsize       # out tiles (double-buffered)
        + tm_eff * I * 4                      # fc1 intermediate
    )
    vmem_bytes = min(int(vmem_bytes * 1.5) + (4 << 20), 100 << 20)

    cost = pl.CostEstimate(
        flops=int(4 * Mp * H * I),            # two matmuls
        transcendentals=int(Mp * I),          # tanh on the intermediate
        bytes_accessed=int(
            Mp * H * c_itemsize + (H * I + I * H) * c_itemsize
            + (I + H) * 4 + Mp * H * out_itemsize),
    )

    def build(single_buffer_consts):
        if single_buffer_consts:
            # Constant index_map => no benefit from double buffering; keep a
            # single VMEM copy of weights/biases (critical at real Siglip
            # sizes on v7x's 64 MiB VMEM).
            def const(shape):
                return pl.BlockSpec(shape, lambda i: (0, 0),
                                    pipeline_mode=pl.Buffered(1))
        else:
            def const(shape):
                return pl.BlockSpec(shape, lambda i: (0, 0))

        return pl.pallas_call(
            _mlp_kernel,
            out_shape=jax.ShapeDtypeStruct((Mp, H), x.dtype),
            grid_spec=pltpu.PrefetchScalarGridSpec(
                num_scalar_prefetch=0,
                grid=grid,
                in_specs=[
                    pl.BlockSpec((tm_eff, H), lambda i: (i, 0)),  # x tile
                    const((H, I)),                                # W1 (resident)
                    const((1, I)),                                # b1
                    const((I, H)),                                # W2 (resident)
                    const((1, H)),                                # b2
                ],
                out_specs=pl.BlockSpec((tm_eff, H), lambda i: (i, 0)),
            ),
            compiler_params=pltpu.CompilerParams(
                dimension_semantics=("parallel",),
                vmem_limit_bytes=vmem_bytes),
            cost_estimate=cost,
        )

    try:
        out2d = build(True)(x2d, w1c, b1_2d, w2c, b2_2d)
    except Exception:
        # Fallback if pipeline_mode=pl.Buffered(1) is unsupported in this build.
        out2d = build(False)(x2d, w1c, b1_2d, w2c, b2_2d)

    return out2d[:M].reshape(B, S, H)


def _reference_mlp(x2d, w1, b1, w2, b2, compute_dtype):
    """Pure-JAX reference mimicking the kernel's numerics."""
    xc = x2d.astype(compute_dtype)
    h = jnp.dot(xc, w1.astype(compute_dtype),
                preferred_element_type=jnp.float32) + b1
    c = 0.7978845608028654
    h = 0.5 * h * (1.0 + jnp.tanh(c * (h + 0.044715 * (h * h * h))))
    o = jnp.dot(h.astype(compute_dtype), w2.astype(compute_dtype),
                preferred_element_type=jnp.float32) + b2
    return o


if __name__ == "__main__":
    # Small config consistent with the module's MLP block:
    # hidden_size=128, intermediate_size=256, batch=2, seq=16.
    B, S, H, I = 2, 16, 128, 256

    key = jax.random.PRNGKey(0)
    kx, kw1, kb1, kw2, kb2 = jax.random.split(key, 5)

    x = jax.random.normal(kx, (B, S, H), dtype=jnp.float32)

    # Deterministic init mimicking nn.Linear (uniform +/- 1/sqrt(fan_in)),
    # stored as (in_features, out_features) so the kernel computes x @ W.
    lim1 = 1.0 / (H ** 0.5)
    lim2 = 1.0 / (I ** 0.5)
    w1 = jax.random.uniform(kw1, (H, I), jnp.float32, -lim1, lim1)
    b1 = jax.random.uniform(kb1, (I,), jnp.float32, -lim1, lim1)
    w2 = jax.random.uniform(kw2, (I, H), jnp.float32, -lim2, lim2)
    b2 = jax.random.uniform(kb2, (H,), jnp.float32, -lim2, lim2)

    out = siglip_mlp(x, w1, b1, w2, b2)
    out = jax.block_until_ready(out)
    assert out.shape == (B, S, H)
    assert out.dtype == x.dtype

    x2d = x.reshape(B * S, H)
    # Tight check against a reference with matching numerics (bf16 operands,
    # f32 accumulate).
    ref_bf16 = _reference_mlp(x2d, w1, b1, w2, b2, jnp.bfloat16).reshape(B, S, H)
    assert jnp.allclose(out, ref_bf16, atol=2e-3, rtol=2e-3), \
        "mismatch vs bf16-matched reference"
    # Sanity check against the full-f32 reference (bf16 operand rounding only).
    ref_f32 = _reference_mlp(x2d, w1, b1, w2, b2, jnp.float32).reshape(B, S, H)
    assert jnp.allclose(out, ref_f32, atol=5e-2, rtol=5e-2), \
        "mismatch vs f32 reference"

    print("KERNEL_OK")
</pallas_src>

<mosaic_0001>
module attributes {stable_mosaic.version = 11 : i64} {
  func.func @_mlp_kernel(%arg0: i32, %arg1: memref<32x128xbf16, #tpu.memory_space<vmem>>, %arg2: memref<128x256xbf16, #tpu.memory_space<vmem>>, %arg3: memref<1x256xf32, #tpu.memory_space<vmem>>, %arg4: memref<256x128xbf16, #tpu.memory_space<vmem>>, %arg5: memref<1x128xf32, #tpu.memory_space<vmem>>, %arg6: memref<32x128xf32, #tpu.memory_space<vmem>>) attributes {dimension_semantics = [#tpu.dimension_semantics<parallel>], iteration_bounds = array<i64: 1>, scalar_prefetch = 0 : i64, scratch_operands = 0 : i64, tpu.core_type = #tpu.core_type<tc>, window_params = [{transform_indices = @transform_0, window_bounds = array<i64: 32, 128>}, {pipeline_mode = #tpu.pipeline_mode<synchronous>, transform_indices = @transform_1, window_bounds = array<i64: 128, 256>}, {pipeline_mode = #tpu.pipeline_mode<synchronous>, transform_indices = @transform_2, window_bounds = array<i64: 1, 256>}, {pipeline_mode = #tpu.pipeline_mode<synchronous>, transform_indices = @transform_3, window_bounds = array<i64: 256, 128>}, {pipeline_mode = #tpu.pipeline_mode<synchronous>, transform_indices = @transform_4, window_bounds = array<i64: 1, 128>}, {transform_indices = @transform_5, window_bounds = array<i64: 32, 128>}]} {
    %c0 = arith.constant 0 : index
    %c0_0 = arith.constant 0 : index
    %0 = vector.load %arg1[%c0, %c0_0] : memref<32x128xbf16, #tpu.memory_space<vmem>>, vector<32x128xbf16>
    %c0_1 = arith.constant 0 : index
    %c0_2 = arith.constant 0 : index
    %1 = vector.load %arg2[%c0_1, %c0_2] : memref<128x256xbf16, #tpu.memory_space<vmem>>, vector<128x256xbf16>
    %cst = arith.constant dense<0.000000e+00> : vector<32x256xf32>
    %2 = tpu.matmul %0, %1, %cst {dimension_numbers = #tpu.dot_dimension_numbers<[1], [0], [0], [1], [0, 0, 1, 1], [], []>} : vector<32x128xbf16>, vector<128x256xbf16>, vector<32x256xf32> -> vector<32x256xf32>
    %c0_3 = arith.constant 0 : index
    %c0_4 = arith.constant 0 : index
    %3 = vector.load %arg3[%c0_3, %c0_4] : memref<1x256xf32, #tpu.memory_space<vmem>>, vector<1x256xf32>
    %4 = vector.broadcast %3 : vector<1x256xf32> to vector<32x256xf32>
    %5 = arith.addf %2, %4 : vector<32x256xf32>
    %cst_5 = arith.constant 5.000000e-01 : f32
    %6 = vector.broadcast %cst_5 : f32 to vector<32x256xf32>
    %7 = arith.mulf %6, %5 : vector<32x256xf32>
    %8 = arith.mulf %5, %5 : vector<32x256xf32>
    %9 = arith.mulf %8, %5 : vector<32x256xf32>
    %cst_6 = arith.constant 4.471500e-02 : f32
    %10 = vector.broadcast %cst_6 : f32 to vector<32x256xf32>
    %11 = arith.mulf %10, %9 : vector<32x256xf32>
    %12 = arith.addf %5, %11 : vector<32x256xf32>
    %cst_7 = arith.constant 0.797884583 : f32
    %13 = vector.broadcast %cst_7 : f32 to vector<32x256xf32>
    %14 = arith.mulf %13, %12 : vector<32x256xf32>
    %15 = math.tanh %14 : vector<32x256xf32>
    %cst_8 = arith.constant 1.000000e+00 : f32
    %16 = vector.broadcast %cst_8 : f32 to vector<32x256xf32>
    %17 = arith.addf %16, %15 : vector<32x256xf32>
    %18 = arith.mulf %7, %17 : vector<32x256xf32>
    %19 = arith.truncf %18 : vector<32x256xf32> to vector<32x256xbf16>
    %c0_9 = arith.constant 0 : index
    %c0_10 = arith.constant 0 : index
    %20 = vector.load %arg4[%c0_9, %c0_10] : memref<256x128xbf16, #tpu.memory_space<vmem>>, vector<256x128xbf16>
    %cst_11 = arith.constant dense<0.000000e+00> : vector<32x128xf32>
    %21 = tpu.matmul %19, %20, %cst_11 {dimension_numbers = #tpu.dot_dimension_numbers<[1], [0], [0], [1], [0, 0, 1, 1], [], []>} : vector<32x256xbf16>, vector<256x128xbf16>, vector<32x128xf32> -> vector<32x128xf32>
    %c0_12 = arith.constant 0 : index
    %c0_13 = arith.constant 0 : index
    %22 = vector.load %arg5[%c0_12, %c0_13] : memref<1x128xf32, #tpu.memory_space<vmem>>, vector<1x128xf32>
    %23 = vector.broadcast %22 : vector<1x128xf32> to vector<32x128xf32>
    %24 = arith.addf %21, %23 : vector<32x128xf32>
    %c0_14 = arith.constant 0 : index
    %c0_15 = arith.constant 0 : index
    %25 = vector.load %arg6[%c0_14, %c0_15] : memref<32x128xf32, #tpu.memory_space<vmem>>, vector<32x128xf32>
    tpu.vector_store %arg6[%c0_14, %c0_15], %24 {strides = array<i32>} : memref<32x128xf32, #tpu.memory_space<vmem>>, vector<32x128xf32>,
    return
  }
  func.func @transform_0(%arg0: i32) -> (i32, i32) {
    %c0_i32 = arith.constant 0 : i32
    %c0_i32_0 = arith.constant 0 : i32
    return %arg0, %c0_i32 : i32, i32
  }
  func.func @transform_1(%arg0: i32) -> (i32, i32) {
    %c0_i32 = arith.constant 0 : i32
    %c0_i32_0 = arith.constant 0 : i32
    %c0_i32_1 = arith.constant 0 : i32
    return %c0_i32, %c0_i32_0 : i32, i32
  }
  func.func @transform_2(%arg0: i32) -> (i32, i32) {
    %c0_i32 = arith.constant 0 : i32
    %c0_i32_0 = arith.constant 0 : i32
    %c0_i32_1 = arith.constant 0 : i32
    return %c0_i32, %c0_i32_0 : i32, i32
  }
  func.func @transform_3(%arg0: i32) -> (i32, i32) {
    %c0_i32 = arith.constant 0 : i32
    %c0_i32_0 = arith.constant 0 : i32
    %c0_i32_1 = arith.constant 0 : i32
    return %c0_i32, %c0_i32_0 : i32, i32
  }
  func.func @transform_4(%arg0: i32) -> (i32, i32) {
    %c0_i32 = arith.constant 0 : i32
    %c0_i32_0 = arith.constant 0 : i32
    %c0_i32_1 = arith.constant 0 : i32
    return %c0_i32, %c0_i32_0 : i32, i32
  }
  func.func @transform_5(%arg0: i32) -> (i32, i32) {
    %c0_i32 = arith.constant 0 : i32
    %c0_i32_0 = arith.constant 0 : i32
    return %arg0, %c0_i32 : i32, i32
  }
}

module attributes {stable_mosaic.version = 11 : i64} {
  func.func @_mlp_kernel(%arg0: i32, %arg1: memref<32x128xbf16, #tpu.memory_space<vmem>>, %arg2: memref<128x256xbf16, #tpu.memory_space<vmem>>, %arg3: memref<1x256xf32, #tpu.memory_space<vmem>>, %arg4: memref<256x128xbf16, #tpu.memory_space<vmem>>, %arg5: memref<1x128xf32, #tpu.memory_space<vmem>>, %arg6: memref<32x128xf32, #tpu.memory_space<vmem>>) attributes {dimension_semantics = [#tpu.dimension_semantics<parallel>], iteration_bounds = array<i64: 1>, scalar_prefetch = 0 : i64, scratch_operands = 0 : i64, tpu.core_type = #tpu.core_type<tc>, window_params = [{transform_indices = @transform_0, window_bounds = array<i64: 32, 128>}, {pipeline_mode = #tpu.pipeline_mode<synchronous>, transform_indices = @transform_1, window_bounds = array<i64: 128, 256>}, {pipeline_mode = #tpu.pipeline_mode<synchronous>, transform_indices = @transform_2, window_bounds = array<i64: 1, 256>}, {pipeline_mode = #tpu.pipeline_mode<synchronous>, transform_indices = @transform_3, window_bounds = array<i64: 256, 128>}, {pipeline_mode = #tpu.pipeline_mode<synchronous>, transform_indices = @transform_4, window_bounds = array<i64: 1, 128>}, {transform_indices = @transform_5, window_bounds = array<i64: 32, 128>}]} {
    %c0 = arith.constant 0 : index
    %c0_0 = arith.constant 0 : index
    %0 = vector.load %arg1[%c0, %c0_0] : memref<32x128xbf16, #tpu.memory_space<vmem>>, vector<32x128xbf16>
    %c0_1 = arith.constant 0 : index
    %c0_2 = arith.constant 0 : index
    %1 = vector.load %arg2[%c0_1, %c0_2] : memref<128x256xbf16, #tpu.memory_space<vmem>>, vector<128x256xbf16>
    %cst = arith.constant dense<0.000000e+00> : vector<32x256xf32>
    %2 = tpu.matmul %0, %1, %cst {dimension_numbers = #tpu.dot_dimension_numbers<[1], [0], [0], [1], [0, 0, 1, 1], [], []>} : vector<32x128xbf16>, vector<128x256xbf16>, vector<32x256xf32> -> vector<32x256xf32>
    %c0_3 = arith.constant 0 : index
    %c0_4 = arith.constant 0 : index
    %3 = vector.load %arg3[%c0_3, %c0_4] : memref<1x256xf32, #tpu.memory_space<vmem>>, vector<1x256xf32>
    %4 = vector.broadcast %3 : vector<1x256xf32> to vector<32x256xf32>
    %5 = arith.addf %2, %4 : vector<32x256xf32>
    %cst_5 = arith.constant 5.000000e-01 : f32
    %6 = vector.broadcast %cst_5 : f32 to vector<32x256xf32>
    %7 = arith.mulf %6, %5 : vector<32x256xf32>
    %8 = arith.mulf %5, %5 : vector<32x256xf32>
    %9 = arith.mulf %8, %5 : vector<32x256xf32>
    %cst_6 = arith.constant 4.471500e-02 : f32
    %10 = vector.broadcast %cst_6 : f32 to vector<32x256xf32>
    %11 = arith.mulf %10, %9 : vector<32x256xf32>
    %12 = arith.addf %5, %11 : vector<32x256xf32>
    %cst_7 = arith.constant 0.797884583 : f32
    %13 = vector.broadcast %cst_7 : f32 to vector<32x256xf32>
    %14 = arith.mulf %13, %12 : vector<32x256xf32>
    %15 = math.tanh %14 : vector<32x256xf32>
    %cst_8 = arith.constant 1.000000e+00 : f32
    %16 = vector.broadcast %cst_8 : f32 to vector<32x256xf32>
    %17 = arith.addf %16, %15 : vector<32x256xf32>
    %18 = arith.mulf %7, %17 : vector<32x256xf32>
    %19 = arith.truncf %18 : vector<32x256xf32> to vector<32x256xbf16>
    %c0_9 = arith.constant 0 : index
    %c0_10 = arith.constant 0 : index
    %20 = vector.load %arg4[%c0_9, %c0_10] : memref<256x128xbf16, #tpu.memory_space<vmem>>, vector<256x128xbf16>
    %cst_11 = arith.constant dense<0.000000e+00> : vector<32x128xf32>
    %21 = tpu.matmul %19, %20, %cst_11 {dimension_numbers = #tpu.dot_dimension_numbers<[1], [0], [0], [1], [0, 0, 1, 1], [], []>} : vector<32x256xbf16>, vector<256x128xbf16>, vector<32x128xf32> -> vector<32x128xf32>
    %c0_12 = arith.constant 0 : index
    %c0_13 = arith.constant 0 : index
    %22 = vector.load %arg5[%c0_12, %c0_13] : memref<1x128xf32, #tpu.memory_space<vmem>>, vector<1x128xf32>
    %23 = vector.broadcast %22 : vector<1x128xf32> to vector<32x128xf32>
    %24 = arith.addf %21, %23 : vector<32x128xf32>
    %c0_14 = arith.constant 0 : index
    %c0_15 = arith.constant 0 : index
    %25 = vector.load %arg6[%c0_14, %c0_15] : memref<32x128xf32, #tpu.memory_space<vmem>>, vector<32x128xf32>
    tpu.vector_store %arg6[%c0_14, %c0_15], %24 {strides = array<i32>} : memref<32x128xf32, #tpu.memory_space<vmem>>, vector<32x128xf32>,
    return
  }
  func.func @transform_0(%arg0: i32) -> (i32, i32) {
    %c0_i32 = arith.constant 0 : i32
    %c0_i32_0 = arith.constant 0 : i32
    return %arg0, %c0_i32 : i32, i32
  }
  func.func @transform_1(%arg0: i32) -> (i32, i32) {
    %c0_i32 = arith.constant 0 : i32
    %c0_i32_0 = arith.constant 0 : i32
    %c0_i32_1 = arith.constant 0 : i32
    return %c0_i32, %c0_i32_0 : i32, i32
  }
  func.func @transform_2(%arg0: i32) -> (i32, i32) {
    %c0_i32 = arith.constant 0 : i32
    %c0_i32_0 = arith.constant 0 : i32
    %c0_i32_1 = arith.constant 0 : i32
    return %c0_i32, %c0_i32_0 : i32, i32
  }
  func.func @transform_3(%arg0: i32) -> (i32, i32) {
    %c0_i32 = arith.constant 0 : i32
    %c0_i32_0 = arith.constant 0 : i32
    %c0_i32_1 = arith.constant 0 : i32
    return %c0_i32, %c0_i32_0 : i32, i32
  }
  func.func @transform_4(%arg0: i32) -> (i32, i32) {
    %c0_i32 = arith.constant 0 : i32
    %c0_i32_0 = arith.constant 0 : i32
    %c0_i32_1 = arith.constant 0 : i32
    return %c0_i32, %c0_i32_0 : i32, i32
  }
  func.func @transform_5(%arg0: i32) -> (i32, i32) {
    %c0_i32 = arith.constant 0 : i32
    %c0_i32_0 = arith.constant 0 : i32
    return %arg0, %c0_i32 : i32, i32
  }
}

</mosaic_0001>

<bundles_post_ra>
// kernel: tpu_custom_call.1
= control target key start
LH: loop header
LB: loop body
LE: loop exit
PB: predicated region body
PF: predicated region fallthrough
CT: control target
= control target key end

     0   :  { %10 = vsyncpa [#allocation3], 0  ;;  %s887_s0 = inlined_call_operand.hbm [shape: bf16[32,128], index: 0, kind: input, shape index: {}]   ;;  %s888_s1 = inlined_call_operand.hbm [shape: bf16[128,256], index: 1, kind: input, shape index: {}]   ;;  %s889_s2 = inlined_call_operand.vmem [shape: f32[1,256], index: 2, kind: input, shape index: {}]   ;;  %s890_s3 = inlined_call_operand.hbm [shape: bf16[256,128], index: 3, kind: input, shape index: {}]   ;;  %s891_s4 = inlined_call_operand.vmem [shape: f32[1,128], index: 4, kind: input, shape index: {}]   ;;  %s892_s5 = inlined_call_operand.hbm [shape: f32[32,128], index: 5, kind: output, shape index: {}]  }
   0x1   :  { %11 = vsyncpa [#allocation6], 0 }
   0x2   :  { %12 = vsyncpa [#allocation4], 0  ;;  %s746_s18 = smov [#allocation5]   ;;  %s652_s22 = scalar_lea.hbm %s888_s1, 2048 }
   0x3   :  { %s30_s19 = sshll.u32 %s746_s18, 4  ;;  %p653_p0 = scmp.ne.s32.totalorder %s888_s1, %s652_s22  ;;  %s31_s19 = int_to_ptr.vmem [resolvable:$true] %s30_s19 }
   0x4   :  { %p656_p1 = scmp.lt.u32.totalorder %s652_s22, %s888_s1 }
   0x6   :  { %p658_p2 = pnand %p656_p1, %p653_p0 }
   0x8   :  { %661 = shalt.err (!%p658_p2)
}
   0x9   :  { %s662_s27 = scalar_lea.vmem %s31_s19, 2048  ;;  %p667_p4 = scmp.lt.s32.totalorder %s31_s19, %s31_s19 }
   0xa   :  { %p663_p3 = scmp.ne.s32.totalorder %s31_s19, %s662_s27  ;;  %p668_p5 = scmp.lt.s32.totalorder %s662_s27, %s662_s27 }
   0xc   :  { %p669_p6 = por %p668_p5, %p667_p4 }
   0xe   :  { %p670_p7 = pnand %p669_p6, %p663_p3 }
  0x10   :  { %673 = shalt.err (!%p670_p7)
}
  0x11   :  { %s747_s28 = smov 128   ;;  %s748_s29 = smov 8  }
  0x12   :  { %36 = dma.hbm_to_vmem [thread:$0]  %s888_s1, 2048, %s31_s19, [#allocation6], %s747_s28, %s747_s28, %s748_s29  }
  0x13   :  { %s749_s7 = smov [#allocation2]   ;;  %s674_s11 = scalar_lea.hbm %s887_s0, 256 }
  0x14   :  { %s18_s8 = sshll.u32 %s749_s7, 4  ;;  %p675_p8 = scmp.ne.s32.totalorder %s887_s0, %s674_s11  ;;  %s19_s8 = int_to_ptr.vmem [resolvable:$true] %s18_s8 }
  0x15   :  { %p678_p9 = scmp.lt.u32.totalorder %s674_s11, %s887_s0 }
  0x17   :  { %p680_p10 = pnand %p678_p9, %p675_p8 }
  0x19   :  { %683 = shalt.err (!%p680_p10)
}
  0x1a   :  { %s684_s16 = scalar_lea.vmem %s19_s8, 256  ;;  %p689_p12 = scmp.lt.s32.totalorder %s19_s8, %s19_s8 }
  0x1b   :  { %p685_p11 = scmp.ne.s32.totalorder %s19_s8, %s684_s16  ;;  %p690_p13 = scmp.lt.s32.totalorder %s684_s16, %s684_s16 }
  0x1d   :  { %p691_p0 = por %p690_p13, %p689_p12 }
  0x1f   :  { %p692_p1 = pnand %p691_p0, %p685_p11 }
  0x21   :  { %695 = shalt.err (!%p692_p1)
}
  0x22   :  { %s750_s1 = smov 64   ;;  %s751_s17 = smov 4  }
  0x23   :  { %24 = dma.hbm_to_vmem [thread:$0]  %s887_s0, 256, %s19_s8, [#allocation3], %s750_s1, %s750_s1, %s751_s17  }
  0x24   :  { %s752_s20 = smov [#allocation7]   ;;  %s696_s24 = scalar_lea.hbm %s890_s3, 2048 }
  0x25   :  { %s44_s21 = sshll.u32 %s752_s20, 4  ;;  %p697_p2 = scmp.ne.s32.totalorder %s890_s3, %s696_s24  ;;  %s45_s21 = int_to_ptr.vmem [resolvable:$true] %s44_s21 }
  0x26   :  { %p700_p3 = scmp.lt.u32.totalorder %s696_s24, %s890_s3 }
  0x28   :  { %p702_p4 = pnand %p700_p3, %p697_p2 }
  0x2a   :  { %705 = shalt.err (!%p702_p4)
}
  0x2b   :  { %s706_s6 = scalar_lea.vmem %s45_s21, 2048  ;;  %p711_p6 = scmp.lt.s32.totalorder %s45_s21, %s45_s21 }
  0x2c   :  { %p707_p5 = scmp.ne.s32.totalorder %s45_s21, %s706_s6  ;;  %p712_p7 = scmp.lt.s32.totalorder %s706_s6, %s706_s6 }
  0x2e   :  { %p713_p8 = por %p712_p7, %p711_p6 }
  0x30   :  { %p714_p9 = pnand %p713_p8, %p707_p5 }
  0x32   :  { %717 = shalt.err (!%p714_p9)
}
  0x33   :  { %50 = dma.hbm_to_vmem [thread:$0]  %s890_s3, 2048, %s45_s21, [#allocation6], %s750_s1, %s750_s1, %s751_s17  }
  0x34   :  { %740 = dma.done.wait [#allocation3], 256  }
  0x35   :  { %741 = vsyncadd [#allocation3], 4294967040 }
  0x36   :  { %742 = dma.done.wait [#allocation6], 4096  }
  0x37   :  { %743 = vsyncadd [#allocation6], 4294963200  ;;  %v753_v0 = vmov 0   ;;  %v594_v1 = vld [vmem:[#allocation5 + $0x4] ss:$8 sps:$4 sm:$0xff]   ;;  %v618_v17 = vld [vmem:[#allocation2] sm:$0xff]   ;;  %v85_v35 = vlaneseq }
  0x38   :  { %219 = vmatprep.mubr.bf16.mxu0 %v753_v0  ;;  %v596_v2 = vld [vmem:[#allocation5] ss:$8 sps:$4 sm:$0xff]   ;;  %187 = vmatprep.subr.bf16.mxu0 %v594_v1  ;;  %v597_v3 = vld [vmem:[#allocation5 + $0x14] ss:$8 sps:$4 sm:$0xff]   ;;  %v599_v4 = vld [vmem:[#allocation5 + $0x10] ss:$8 sps:$4 sm:$0xff]  }
  0x39   :  { %188 = vmatpush1.bf16.msra.mxu0 %v596_v2  ;;  %v600_v5 = vld [vmem:[#allocation5 + $0x24] ss:$8 sps:$4 sm:$0xff]   ;;  %v602_v6 = vld [vmem:[#allocation5 + $0x20] ss:$8 sps:$4 sm:$0xff]   ;;  %v603_v7 = vld [vmem:[#allocation5 + $0x34] ss:$8 sps:$4 sm:$0xff]  }
  0x3a   :  { %189 = vmatprep.subr.bf16.mxu0 %v597_v3  ;;  %v605_v8 = vld [vmem:[#allocation5 + $0x30] ss:$8 sps:$4 sm:$0xff]   ;;  %v606_v9 = vld [vmem:[#allocation5 + $0x44] ss:$8 sps:$4 sm:$0xff]   ;;  %v608_v10 = vld [vmem:[#allocation5 + $0x40] ss:$8 sps:$4 sm:$0xff]  }
  0x3b   :  { %v609_v11 = vld [vmem:[#allocation5 + $0x54] ss:$8 sps:$4 sm:$0xff]   ;;  %v611_v12 = vld [vmem:[#allocation5 + $0x50] ss:$8 sps:$4 sm:$0xff]   ;;  %v612_v13 = vld [vmem:[#allocation5 + $0x64] ss:$8 sps:$4 sm:$0xff]  }
  0x3c   :  { %v614_v14 = vld [vmem:[#allocation5 + $0x60] ss:$8 sps:$4 sm:$0xff]   ;;  %v615_v15 = vld [vmem:[#allocation5 + $0x74] ss:$8 sps:$4 sm:$0xff]   ;;  %v617_v16 = vld [vmem:[#allocation5 + $0x70] ss:$8 sps:$4 sm:$0xff]  }
  0x3d   :  { %190 = vmatpush1.bf16.msra.mxu0 %v599_v4  ;;  %v619_v18 = vld [vmem:[#allocation2 + $0x8] sm:$0xff]   ;;  %v620_v19 = vld [vmem:[#allocation7 + $0x40] sm:$0xff]   ;;  %v622_v21 = vld [vmem:[#allocation7 + $0x48] sm:$0xff]   ;;  %v86_v36 = vshrl.u32 %v85_v35, 7  ;;  %s754_s10 = smov [#allocation8]  }
  0x3e   :  { %191 = vmatprep.subr.bf16.mxu0 %v600_v5  ;;  %v621_v20 = vld [vmem:[#allocation7] sm:$0xff]   ;;  %557 = vmatprep.subr.bf16.mxu1 %v620_v19  ;;  %v623_v22 = vld [vmem:[#allocation7 + $0x8] sm:$0xff]   ;;  %v624_v23 = vld [vmem:[#allocation7 + $0x50] sm:$0xff]   ;;  %s509_s11 = sshll.u32 %s754_s10, 4  ;;  %s510_s11 = int_to_ptr.vmem [resolvable:$true] %s509_s11 }
  0x3f   :  { %558 = vmatpush3.bf16.msra.mxu1 %v621_v20  ;;  %v625_v24 = vld [vmem:[#allocation7 + $0x10] sm:$0xff]   ;;  %v626_v25 = vld [vmem:[#allocation7 + $0x58] sm:$0xff]   ;;  %v628_v27 = vld [vmem:[#allocation7 + $0x60] sm:$0xff]   ;;  %v87_v37 = vsub.s32 0, %v86_v36  ;;  %v91_v39 = vsub.s32 1, %v86_v36  ;;  %p723_p11 = scmp.lt.s32.totalorder %s510_s11, %s510_s11 }
  0x40   :  { %559 = vmatprep.subr.bf16.mxu1 %v622_v21  ;;  %v627_v26 = vld [vmem:[#allocation7 + $0x18] sm:$0xff]   ;;  %v629_v28 = vld [vmem:[#allocation7 + $0x20] sm:$0xff]   ;;  %v630_v29 = vld [vmem:[#allocation7 + $0x68] sm:$0xff]  }
  0x41   :  { %192 = vmatpush1.bf16.msra.mxu0 %v602_v6  ;;  %v631_v30 = vld [vmem:[#allocation7 + $0x28] sm:$0xff]   ;;  %v632_v31 = vld [vmem:[#allocation7 + $0x70] sm:$0xff]   ;;  %v634_v33 = vld [vmem:[#allocation7 + $0x78] sm:$0xff]  }
  0x42   :  { %193 = vmatprep.subr.bf16.mxu0 %v603_v7  ;;  %v633_v32 = vld [vmem:[#allocation7 + $0x30] sm:$0xff]   ;;  %v635_v34 = vld [vmem:[#allocation7 + $0x38] sm:$0xff]  }
  0x43   :  { %560 = vmatpush3.bf16.msra.mxu1 %v623_v22  ;;  %v83_v38 = vld [vmem:[%s889_s2] sm:$0x3] }
  0x44   :  { %561 = vmatprep.subr.bf16.mxu1 %v624_v23  ;;  %v88_v40 = vrot.slane %v83_v38, %v87_v37  ;;  %v92_v41 = vrot.slane %v83_v38, %v91_v39 }
  0x45   :  { %194 = vmatpush1.bf16.msra.mxu0 %v605_v8 }
  0x46   :  { %195 = vmatprep.subr.bf16.mxu0 %v606_v9 }
  0x47   :  { %562 = vmatpush3.bf16.msra.mxu1 %v625_v24 }
  0x48   :  { %563 = vmatprep.subr.bf16.mxu1 %v626_v25 }
  0x49   :  { %196 = vmatpush1.bf16.msra.mxu0 %v608_v10 }
  0x4a   :  { %197 = vmatprep.subr.bf16.mxu0 %v609_v11 }
  0x4b   :  { %564 = vmatpush3.bf16.msra.mxu1 %v627_v26 }
  0x4c   :  { %565 = vmatprep.subr.bf16.mxu1 %v628_v27 }
  0x4d   :  { %198 = vmatpush1.bf16.msra.mxu0 %v611_v12 }
  0x4e   :  { %199 = vmatprep.subr.bf16.mxu0 %v612_v13 }
  0x4f   :  { %566 = vmatpush3.bf16.msra.mxu1 %v629_v28 }
  0x50   :  { %567 = vmatprep.subr.bf16.mxu1 %v630_v29 }
  0x51   :  { %200 = vmatpush1.bf16.msra.mxu0 %v614_v14 }
  0x52   :  { %201 = vmatprep.subr.bf16.mxu0 %v615_v15 }
  0x53   :  { %568 = vmatpush3.bf16.msra.mxu1 %v631_v30 }
  0x54   :  { %569 = vmatprep.subr.bf16.mxu1 %v632_v31 }
  0x55   :  { %202 = vmatpush1.bf16.msra.mxu0 %v617_v16 }
  0x57   :  { %570 = vmatpush3.bf16.msra.mxu1 %v633_v32 }
  0x58   :  { %220 = vmatmul.mubr.bf16.vlgmr.msra.gmra.mrb[0].mxu0 %v618_v17  ;;  %571 = vmatprep.subr.bf16.mxu1 %v634_v33 }
  0x59   :  { %229 = vmatprep.mubr.bf16.mxu0 %v753_v0 }
  0x5b   :  { %572 = vmatpush3.bf16.msra.mxu1 %v635_v34 }
  0x60   :  { %230 = vmatmul.mubr.bf16.gmra.mrb[4].mxu0 %v619_v18 }
 0x12b   :  { %v221_v42 = vpop.f32.mrb[0].mxu0 }
 0x12c   :  { %v827_v43 = vadd.f32 %v221_v42, %v88_v40  ;;  %v223_v44 = vpop.f32.mrb[1].mxu0 }
 0x12d   :  { %v829_v45 = vadd.f32 %v223_v44, %v92_v41  ;;  %v225_v46 = vpop.f32.mrb[2].mxu0 }
 0x12e   :  { %v248_v47 = vmul.f32 %v827_v43, %v827_v43  ;;  %v833_v48 = vadd.f32 %v225_v46, %v88_v40  ;;  %v227_v49 = vpop.f32.mrb[3].mxu0 }
 0x12f   :  { %v249_v50 = vmul.f32 %v829_v45, %v829_v45  ;;  %v837_v51 = vadd.f32 %v227_v49, %v92_v41  ;;  %v241_v44 = vmul.f32 0.5, %v829_v45 }
 0x130   :  { %v256_v52 = vmul.f32 %v248_v47, %v827_v43  ;;  %v250_v53 = vmul.f32 %v833_v48, %v833_v48 }
 0x131   :  { %v257_v54 = vmul.f32 %v249_v50, %v829_v45  ;;  %v251_v55 = vmul.f32 %v837_v51, %v837_v51  ;;  %v243_v46 = vmul.f32 0.5, %v837_v51 }
 0x132   :  { %v264_v56 = vmul.f32 0.044715, %v256_v52  ;;  %v258_v57 = vmul.f32 %v250_v53, %v833_v48 }
 0x133   :  { %v265_v58 = vmul.f32 0.044715, %v257_v54  ;;  %v259_v59 = vmul.f32 %v251_v55, %v837_v51  ;;  %v231_v60 = vpop.f32.mrb[4].mxu0 }
 0x134   :  { %v272_v61 = vadd.f32 %v264_v56, %v827_v43  ;;  %v266_v62 = vmul.f32 0.044715, %v258_v57  ;;  %v848_v63 = vadd.f32 %v231_v60, %v88_v40  ;;  %v233_v0 = vpop.f32.mrb[5].mxu0 }
 0x135   :  { %v267_v1 = vmul.f32 0.044715, %v259_v59  ;;  %v850_v2 = vadd.f32 %v233_v0, %v92_v41  ;;  %v235_v3 = vpop.f32.mrb[6].mxu0  ;;  %v273_v4 = vadd.f32 %v265_v58, %v829_v45 }
 0x136   :  { %v280_v5 = vmul.f32 0.7978846, %v272_v61  ;;  %v274_v6 = vadd.f32 %v266_v62, %v833_v48  ;;  %v252_v7 = vmul.f32 %v848_v63, %v848_v63  ;;  %v236_v8 = vadd.f32 %v235_v3, %v88_v40  ;;  %v237_v9 = vpop.f32.mrb[7].mxu0 }
 0x137   :  { %v253_v10 = vmul.f32 %v850_v2, %v850_v2  ;;  %v238_v11 = vadd.f32 %v237_v9, %v92_v41  ;;  %v275_v12 = vadd.f32 %v267_v1, %v837_v51  ;;  %v281_v13 = vmul.f32 0.7978846, %v273_v4 }
 0x138   :  { %636 = vtanh.f32 %v280_v5  ;;  %v282_v14 = vmul.f32 0.7978846, %v274_v6  ;;  %v260_v15 = vmul.f32 %v252_v7, %v848_v63  ;;  %v254_v16 = vmul.f32 %v236_v8, %v236_v8 }
 0x139   :  { %v261_v17 = vmul.f32 %v253_v10, %v850_v2  ;;  %v255_v18 = vmul.f32 %v238_v11, %v238_v11  ;;  %v283_v19 = vmul.f32 0.7978846, %v275_v12  ;;  %638 = vtanh.f32 %v281_v13  ;;  %v540_v10 = vld [vmem:[%s891_s4] ss:$0 sm:$0xff]  ;;  %s718_s4 = scalar_lea.vmem %s510_s11, 512 }
 0x13a   :  { %640 = vtanh.f32 %v282_v14  ;;  %v268_v20 = vmul.f32 0.044715, %v260_v15  ;;  %v262_v21 = vmul.f32 %v254_v16, %v236_v8  ;;  %v240_v40 = vmul.f32 0.5, %v827_v43  ;;  %p719_p10 = scmp.ne.s32.totalorder %s510_s11, %s718_s4  ;;  %p724_p12 = scmp.lt.s32.totalorder %s718_s4, %s718_s4 }
 0x13b   :  { %v269_v22 = vmul.f32 0.044715, %v261_v17  ;;  %v263_v23 = vmul.f32 %v255_v18, %v238_v11  ;;  %642 = vtanh.f32 %v283_v19  ;;  %v242_v41 = vmul.f32 0.5, %v833_v48 }
 0x13c   :  { %v276_v24 = vadd.f32 %v268_v20, %v848_v63  ;;  %v270_v25 = vmul.f32 0.044715, %v262_v21  ;;  %v244_v48 = vmul.f32 0.5, %v848_v63  ;;  %v246_v45 = vmul.f32 0.5, %v236_v8  ;;  %p725_p13 = por %p724_p12, %p723_p11 }
 0x13d   :  { %v277_v26 = vadd.f32 %v269_v22, %v850_v2  ;;  %v271_v27 = vmul.f32 0.044715, %v263_v23  ;;  %v245_v51 = vmul.f32 0.5, %v850_v2  ;;  %v247_v62 = vmul.f32 0.5, %v238_v11 }
 0x13e   :  { %v284_v28 = vmul.f32 0.7978846, %v276_v24  ;;  %v278_v29 = vadd.f32 %v270_v25, %v236_v8  ;;  %p726_p0 = pnand %p725_p13, %p719_p10 }
 0x13f   :  { %v285_v30 = vmul.f32 0.7978846, %v277_v26  ;;  %v279_v31 = vadd.f32 %v271_v27, %v238_v11 }
 0x140   :  { %644 = vtanh.f32 %v284_v28  ;;  %v286_v32 = vmul.f32 0.7978846, %v278_v29 }
 0x141   :  { %646 = vtanh.f32 %v285_v30  ;;  %v287_v33 = vmul.f32 0.7978846, %v279_v31 }
 0x142   :  { %v637_v34 = vpop.eup %636  ;;  %648 = vtanh.f32 %v286_v32 }
 0x143   :  { %v639_v35 = vpop.eup %638  ;;  %650 = vtanh.f32 %v287_v33  ;;  %v296_v36 = vadd.f32 1.0, %v637_v34 }
 0x144   :  { %v641_v37 = vpop.eup %640  ;;  %v297_v38 = vadd.f32 1.0, %v639_v35 }
 0x145   :  { %v643_v39 = vpop.eup %642  ;;  %v298_v42 = vadd.f32 1.0, %v641_v37  ;;  %v304_v49 = vmul.f32 %v296_v36, %v240_v40 }
 0x146   :  { %v299_v47 = vadd.f32 1.0, %v643_v39  ;;  %v305_v52 = vmul.f32 %v297_v38, %v241_v44 }
 0x147   :  { %v306_v50 = vmul.f32 %v298_v42, %v242_v41 }
 0x148   :  { %v307_v53 = vmul.f32 %v299_v47, %v243_v46 }
 0x149   :  { %v312_v54 = vpack.c.bf16 %v306_v50, %v304_v49 }
 0x14a   :  { %v645_v55 = vpop.eup %644  ;;  %v313_v56 = vpack.c.bf16 %v307_v53, %v305_v52 }
 0x14b   :  { %v647_v57 = vpop.eup %646  ;;  %v300_v58 = vadd.f32 1.0, %v645_v55 }
 0x14c   :  { %v649_v59 = vpop.eup %648  ;;  %483 = vmatprep.mubr.bf16.mxu1 %v313_v56  ;;  %v301_v43 = vadd.f32 1.0, %v647_v57 }
 0x14d   :  { %v651_v60 = vpop.eup %650  ;;  %484 = vmatmul.mubr.bf16.vlgmr.msra.gmra.mrb[0].mxu1 %v312_v54  ;;  %v302_v61 = vadd.f32 1.0, %v649_v59  ;;  %v308_v1 = vmul.f32 %v300_v58, %v244_v48 }
 0x14e   :  { %v303_v0 = vadd.f32 1.0, %v651_v60  ;;  %v309_v4 = vmul.f32 %v301_v43, %v245_v51 }
 0x14f   :  { %v310_v3 = vmul.f32 %v302_v61, %v246_v45 }
 0x150   :  { %v311_v5 = vmul.f32 %v303_v0, %v247_v62 }
 0x151   :  { %v314_v6 = vpack.c.bf16 %v310_v3, %v308_v1 }
 0x152   :  { %v315_v7 = vpack.c.bf16 %v311_v5, %v309_v4 }
 0x154   :  { %491 = vmatprep.mubr.bf16.mxu1 %v315_v7 }
 0x155   :  { %492 = vmatmul.mubr.bf16.gmra.mrb[4].mxu1 %v314_v6 }
 0x220   :  { %v573_v9 = vpop.f32.mrb[0].mxu1 }
 0x221   :  { %v574_v63 = vpop.f32.mrb[1].mxu1 }
 0x222   :  { %v575_v8 = vadd.f32 %v574_v63, %v573_v9  ;;  %v576_v12 = vpop.f32.mrb[2].mxu1 }
 0x223   :  { %v577_v13 = vpop.f32.mrb[3].mxu1 }
 0x224   :  { %v486_v2 = vadd.f32 %v575_v8, %v540_v10  ;;  %v578_v11 = vadd.f32 %v577_v13, %v576_v12 }
 0x226   :  { %500 = vst [vmem:[#allocation8] sm:$0xff] %v486_v2  ;;  %v489_v14 = vadd.f32 %v578_v11, %v540_v10 }
 0x228   :  { %501 = vst [vmem:[#allocation8 + $0x8] sm:$0xff] %v489_v14  ;;  %v579_v15 = vpop.f32.mrb[4].mxu1 }
 0x229   :  { %v580_v16 = vpop.f32.mrb[5].mxu1 }
 0x22a   :  { %v581_v17 = vadd.f32 %v580_v16, %v579_v15  ;;  %v582_v18 = vpop.f32.mrb[6].mxu1 }
 0x22b   :  { %v583_v19 = vpop.f32.mrb[7].mxu1 }
 0x22c   :  { %v494_v20 = vadd.f32 %v581_v17, %v540_v10  ;;  %v584_v21 = vadd.f32 %v583_v19, %v582_v18 }
 0x22e   :  { %502 = vst [vmem:[#allocation8 + $0x10] sm:$0xff] %v494_v20  ;;  %v497_v22 = vadd.f32 %v584_v21, %v540_v10 }
 0x230   :  { %503 = vst [vmem:[#allocation8 + $0x18] sm:$0xff] %v497_v22 }
 0x231   :  { %729 = shalt.err (!%p726_p0)
}
 0x232   :  { %s730_s14 = scalar_lea.hbm %s892_s5, 512 }
 0x233   :  { %p731_p1 = scmp.ne.s32.totalorder %s892_s5, %s730_s14  ;;  %p734_p2 = scmp.lt.u32.totalorder %s730_s14, %s892_s5 }
 0x235   :  { %p736_p3 = pnand %p734_p2, %p731_p1 }
 0x237   :  { %739 = shalt.err (!%p736_p3)
}
 0x238   :  { %515 = dma.vmem_to_hbm [thread:$0]  %s510_s11, 512, %s892_s5, [#allocation4], %s747_s28, %s747_s28, %s748_s29  }
 0x239   :  { %744 = dma.done.wait [#allocation4], 512  }
 0x23a   :  { %745 = vsyncadd [#allocation4], 4294966784 }
 0x23b   :  { %519 = vsyncpa [#allocation3], 1 }
 0x23c   :  { %520 = vsyncpa [#allocation6], 1 }
 0x23d   :  { %521 = vsyncpa [#allocation4], 1 }

// kernel: tpu_custom_call.1
= control target key start
LH: loop header
LB: loop body
LE: loop exit
PB: predicated region body
PF: predicated region fallthrough
CT: control target
= control target key end

     0   :  { %10 = vsyncpa [#allocation3], 0  ;;  %s887_s0 = inlined_call_operand.hbm [shape: bf16[32,128], index: 0, kind: input, shape index: {}]   ;;  %s888_s1 = inlined_call_operand.hbm [shape: bf16[128,256], index: 1, kind: input, shape index: {}]   ;;  %s889_s2 = inlined_call_operand.vmem [shape: f32[1,256], index: 2, kind: input, shape index: {}]   ;;  %s890_s3 = inlined_call_operand.hbm [shape: bf16[256,128], index: 3, kind: input, shape index: {}]   ;;  %s891_s4 = inlined_call_operand.vmem [shape: f32[1,128], index: 4, kind: input, shape index: {}]   ;;  %s892_s5 = inlined_call_operand.hbm [shape: f32[32,128], index: 5, kind: output, shape index: {}]  }
   0x1   :  { %11 = vsyncpa [#allocation6], 0 }
   0x2   :  { %12 = vsyncpa [#allocation4], 0  ;;  %s746_s18 = smov [#allocation5]   ;;  %s652_s22 = scalar_lea.hbm %s888_s1, 2048 }
   0x3   :  { %s30_s19 = sshll.u32 %s746_s18, 4  ;;  %p653_p0 = scmp.ne.s32.totalorder %s888_s1, %s652_s22  ;;  %s31_s19 = int_to_ptr.vmem [resolvable:$true] %s30_s19 }
   0x4   :  { %p656_p1 = scmp.lt.u32.totalorder %s652_s22, %s888_s1 }
   0x6   :  { %p658_p2 = pnand %p656_p1, %p653_p0 }
   0x8   :  { %661 = shalt.err (!%p658_p2)
}
   0x9   :  { %s662_s27 = scalar_lea.vmem %s31_s19, 2048  ;;  %p667_p4 = scmp.lt.s32.totalorder %s31_s19, %s31_s19 }
   0xa   :  { %p663_p3 = scmp.ne.s32.totalorder %s31_s19, %s662_s27  ;;  %p668_p5 = scmp.lt.s32.totalorder %s662_s27, %s662_s27 }
   0xc   :  { %p669_p6 = por %p668_p5, %p667_p4 }
   0xe   :  { %p670_p7 = pnand %p669_p6, %p663_p3 }
  0x10   :  { %673 = shalt.err (!%p670_p7)
}
  0x11   :  { %s747_s28 = smov 128   ;;  %s748_s29 = smov 8  }
  0x12   :  { %36 = dma.hbm_to_vmem [thread:$0]  %s888_s1, 2048, %s31_s19, [#allocation6], %s747_s28, %s747_s28, %s748_s29  }
  0x13   :  { %s749_s7 = smov [#allocation2]   ;;  %s674_s11 = scalar_lea.hbm %s887_s0, 256 }
  0x14   :  { %s18_s8 = sshll.u32 %s749_s7, 4  ;;  %p675_p8 = scmp.ne.s32.totalorder %s887_s0, %s674_s11  ;;  %s19_s8 = int_to_ptr.vmem [resolvable:$true] %s18_s8 }
  0x15   :  { %p678_p9 = scmp.lt.u32.totalorder %s674_s11, %s887_s0 }
  0x17   :  { %p680_p10 = pnand %p678_p9, %p675_p8 }
  0x19   :  { %683 = shalt.err (!%p680_p10)
}
  0x1a   :  { %s684_s16 = scalar_lea.vmem %s19_s8, 256  ;;  %p689_p12 = scmp.lt.s32.totalorder %s19_s8, %s19_s8 }
  0x1b   :  { %p685_p11 = scmp.ne.s32.totalorder %s19_s8, %s684_s16  ;;  %p690_p13 = scmp.lt.s32.totalorder %s684_s16, %s684_s16 }
  0x1d   :  { %p691_p0 = por %p690_p13, %p689_p12 }
  0x1f   :  { %p692_p1 = pnand %p691_p0, %p685_p11 }
  0x21   :  { %695 = shalt.err (!%p692_p1)
}
  0x22   :  { %s750_s1 = smov 64   ;;  %s751_s17 = smov 4  }
  0x23   :  { %24 = dma.hbm_to_vmem [thread:$0]  %s887_s0, 256, %s19_s8, [#allocation3], %s750_s1, %s750_s1, %s751_s17  }
  0x24   :  { %s752_s20 = smov [#allocation7]   ;;  %s696_s24 = scalar_lea.hbm %s890_s3, 2048 }
  0x25   :  { %s44_s21 = sshll.u32 %s752_s20, 4  ;;  %p697_p2 = scmp.ne.s32.totalorder %s890_s3, %s696_s24  ;;  %s45_s21 = int_to_ptr.vmem [resolvable:$true] %s44_s21 }
  0x26   :  { %p700_p3 = scmp.lt.u32.totalorder %s696_s24, %s890_s3 }
  0x28   :  { %p702_p4 = pnand %p700_p3, %p697_p2 }
  0x2a   :  { %705 = shalt.err (!%p702_p4)
}
  0x2b   :  { %s706_s6 = scalar_lea.vmem %s45_s21, 2048  ;;  %p711_p6 = scmp.lt.s32.totalorder %s45_s21, %s45_s21 }
  0x2c   :  { %p707_p5 = scmp.ne.s32.totalorder %s45_s21, %s706_s6  ;;  %p712_p7 = scmp.lt.s32.totalorder %s706_s6, %s706_s6 }
  0x2e   :  { %p713_p8 = por %p712_p7, %p711_p6 }
  0x30   :  { %p714_p9 = pnand %p713_p8, %p707_p5 }
  0x32   :  { %717 = shalt.err (!%p714_p9)
}
  0x33   :  { %50 = dma.hbm_to_vmem [thread:$0]  %s890_s3, 2048, %s45_s21, [#allocation6], %s750_s1, %s750_s1, %s751_s17  }
  0x34   :  { %740 = dma.done.wait [#allocation3], 256  }
  0x35   :  { %741 = vsyncadd [#allocation3], 4294967040 }
  0x36   :  { %742 = dma.done.wait [#allocation6], 4096  }
  0x37   :  { %743 = vsyncadd [#allocation6], 4294963200  ;;  %v753_v0 = vmov 0   ;;  %v594_v1 = vld [vmem:[#allocation5 + $0x4] ss:$8 sps:$4 sm:$0xff]   ;;  %v618_v17 = vld [vmem:[#allocation2] sm:$0xff]   ;;  %v85_v35 = vlaneseq }
  0x38   :  { %219 = vmatprep.mubr.bf16.mxu0 %v753_v0  ;;  %v596_v2 = vld [vmem:[#allocation5] ss:$8 sps:$4 sm:$0xff]   ;;  %187 = vmatprep.subr.bf16.mxu0 %v594_v1  ;;  %v597_v3 = vld [vmem:[#allocation5 + $0x14] ss:$8 sps:$4 sm:$0xff]   ;;  %v599_v4 = vld [vmem:[#allocation5 + $0x10] ss:$8 sps:$4 sm:$0xff]  }
  0x39   :  { %188 = vmatpush1.bf16.msra.mxu0 %v596_v2  ;;  %v600_v5 = vld [vmem:[#allocation5 + $0x24] ss:$8 sps:$4 sm:$0xff]   ;;  %v602_v6 = vld [vmem:[#allocation5 + $0x20] ss:$8 sps:$4 sm:$0xff]   ;;  %v603_v7 = vld [vmem:[#allocation5 + $0x34] ss:$8 sps:$4 sm:$0xff]  }
  0x3a   :  { %189 = vmatprep.subr.bf16.mxu0 %v597_v3  ;;  %v605_v8 = vld [vmem:[#allocation5 + $0x30] ss:$8 sps:$4 sm:$0xff]   ;;  %v606_v9 = vld [vmem:[#allocation5 + $0x44] ss:$8 sps:$4 sm:$0xff]   ;;  %v608_v10 = vld [vmem:[#allocation5 + $0x40] ss:$8 sps:$4 sm:$0xff]  }
  0x3b   :  { %v609_v11 = vld [vmem:[#allocation5 + $0x54] ss:$8 sps:$4 sm:$0xff]   ;;  %v611_v12 = vld [vmem:[#allocation5 + $0x50] ss:$8 sps:$4 sm:$0xff]   ;;  %v612_v13 = vld [vmem:[#allocation5 + $0x64] ss:$8 sps:$4 sm:$0xff]  }
  0x3c   :  { %v614_v14 = vld [vmem:[#allocation5 + $0x60] ss:$8 sps:$4 sm:$0xff]   ;;  %v615_v15 = vld [vmem:[#allocation5 + $0x74] ss:$8 sps:$4 sm:$0xff]   ;;  %v617_v16 = vld [vmem:[#allocation5 + $0x70] ss:$8 sps:$4 sm:$0xff]  }
  0x3d   :  { %190 = vmatpush1.bf16.msra.mxu0 %v599_v4  ;;  %v619_v18 = vld [vmem:[#allocation2 + $0x8] sm:$0xff]   ;;  %v620_v19 = vld [vmem:[#allocation7 + $0x40] sm:$0xff]   ;;  %v622_v21 = vld [vmem:[#allocation7 + $0x48] sm:$0xff]   ;;  %v86_v36 = vshrl.u32 %v85_v35, 7  ;;  %s754_s10 = smov [#allocation8]  }
  0x3e   :  { %191 = vmatprep.subr.bf16.mxu0 %v600_v5  ;;  %v621_v20 = vld [vmem:[#allocation7] sm:$0xff]   ;;  %557 = vmatprep.subr.bf16.mxu1 %v620_v19  ;;  %v623_v22 = vld [vmem:[#allocation7 + $0x8] sm:$0xff]   ;;  %v624_v23 = vld [vmem:[#allocation7 + $0x50] sm:$0xff]   ;;  %s509_s11 = sshll.u32 %s754_s10, 4  ;;  %s510_s11 = int_to_ptr.vmem [resolvable:$true] %s509_s11 }
  0x3f   :  { %558 = vmatpush3.bf16.msra.mxu1 %v621_v20  ;;  %v625_v24 = vld [vmem:[#allocation7 + $0x10] sm:$0xff]   ;;  %v626_v25 = vld [vmem:[#allocation7 + $0x58] sm:$0xff]   ;;  %v628_v27 = vld [vmem:[#allocation7 + $0x60] sm:$0xff]   ;;  %v87_v37 = vsub.s32 0, %v86_v36  ;;  %v91_v39 = vsub.s32 1, %v86_v36  ;;  %p723_p11 = scmp.lt.s32.totalorder %s510_s11, %s510_s11 }
  0x40   :  { %559 = vmatprep.subr.bf16.mxu1 %v622_v21  ;;  %v627_v26 = vld [vmem:[#allocation7 + $0x18] sm:$0xff]   ;;  %v629_v28 = vld [vmem:[#allocation7 + $0x20] sm:$0xff]   ;;  %v630_v29 = vld [vmem:[#allocation7 + $0x68] sm:$0xff]  }
  0x41   :  { %192 = vmatpush1.bf16.msra.mxu0 %v602_v6  ;;  %v631_v30 = vld [vmem:[#allocation7 + $0x28] sm:$0xff]   ;;  %v632_v31 = vld [vmem:[#allocation7 + $0x70] sm:$0xff]   ;;  %v634_v33 = vld [vmem:[#allocation7 + $0x78] sm:$0xff]  }
  0x42   :  { %193 = vmatprep.subr.bf16.mxu0 %v603_v7  ;;  %v633_v32 = vld [vmem:[#allocation7 + $0x30] sm:$0xff]   ;;  %v635_v34 = vld [vmem:[#allocation7 + $0x38] sm:$0xff]  }
  0x43   :  { %560 = vmatpush3.bf16.msra.mxu1 %v623_v22  ;;  %v83_v38 = vld [vmem:[%s889_s2] sm:$0x3] }
  0x44   :  { %561 = vmatprep.subr.bf16.mxu1 %v624_v23  ;;  %v88_v40 = vrot.slane %v83_v38, %v87_v37  ;;  %v92_v41 = vrot.slane %v83_v38, %v91_v39 }
  0x45   :  { %194 = vmatpush1.bf16.msra.mxu0 %v605_v8 }
  0x46   :  { %195 = vmatprep.subr.bf16.mxu0 %v606_v9 }
  0x47   :  { %562 = vmatpush3.bf16.msra.mxu1 %v625_v24 }
  0x48   :  { %563 = vmatprep.subr.bf16.mxu1 %v626_v25 }
  0x49   :  { %196 = vmatpush1.bf16.msra.mxu0 %v608_v10 }
  0x4a   :  { %197 = vmatprep.subr.bf16.mxu0 %v609_v11 }
  0x4b   :  { %564 = vmatpush3.bf16.msra.mxu1 %v627_v26 }
  0x4c   :  { %565 = vmatprep.subr.bf16.mxu1 %v628_v27 }
  0x4d   :  { %198 = vmatpush1.bf16.msra.mxu0 %v611_v12 }
  0x4e   :  { %199 = vmatprep.subr.bf16.mxu0 %v612_v13 }
  0x4f   :  { %566 = vmatpush3.bf16.msra.mxu1 %v629_v28 }
  0x50   :  { %567 = vmatprep.subr.bf16.mxu1 %v630_v29 }
  0x51   :  { %200 = vmatpush1.bf16.msra.mxu0 %v614_v14 }
  0x52   :  { %201 = vmatprep.subr.bf16.mxu0 %v615_v15 }
  0x53   :  { %568 = vmatpush3.bf16.msra.mxu1 %v631_v30 }
  0x54   :  { %569 = vmatprep.subr.bf16.mxu1 %v632_v31 }
  0x55   :  { %202 = vmatpush1.bf16.msra.mxu0 %v617_v16 }
  0x57   :  { %570 = vmatpush3.bf16.msra.mxu1 %v633_v32 }
  0x58   :  { %220 = vmatmul.mubr.bf16.vlgmr.msra.gmra.mrb[0].mxu0 %v618_v17  ;;  %571 = vmatprep.subr.bf16.mxu1 %v634_v33 }
  0x59   :  { %229 = vmatprep.mubr.bf16.mxu0 %v753_v0 }
  0x5b   :  { %572 = vmatpush3.bf16.msra.mxu1 %v635_v34 }
  0x60   :  { %230 = vmatmul.mubr.bf16.gmra.mrb[4].mxu0 %v619_v18 }
 0x12b   :  { %v221_v42 = vpop.f32.mrb[0].mxu0 }
 0x12c   :  { %v827_v43 = vadd.f32 %v221_v42, %v88_v40  ;;  %v223_v44 = vpop.f32.mrb[1].mxu0 }
 0x12d   :  { %v829_v45 = vadd.f32 %v223_v44, %v92_v41  ;;  %v225_v46 = vpop.f32.mrb[2].mxu0 }
 0x12e   :  { %v248_v47 = vmul.f32 %v827_v43, %v827_v43  ;;  %v833_v48 = vadd.f32 %v225_v46, %v88_v40  ;;  %v227_v49 = vpop.f32.mrb[3].mxu0 }
 0x12f   :  { %v249_v50 = vmul.f32 %v829_v45, %v829_v45  ;;  %v837_v51 = vadd.f32 %v227_v49, %v92_v41  ;;  %v241_v44 = vmul.f32 0.5, %v829_v45 }
 0x130   :  { %v256_v52 = vmul.f32 %v248_v47, %v827_v43  ;;  %v250_v53 = vmul.f32 %v833_v48, %v833_v48 }
 0x131   :  { %v257_v54 = vmul.f32 %v249_v50, %v829_v45  ;;  %v251_v55 = vmul.f32 %v837_v51, %v837_v51  ;;  %v243_v46 = vmul.f32 0.5, %v837_v51 }
 0x132   :  { %v264_v56 = vmul.f32 0.044715, %v256_v52  ;;  %v258_v57 = vmul.f32 %v250_v53, %v833_v48 }
 0x133   :  { %v265_v58 = vmul.f32 0.044715, %v257_v54  ;;  %v259_v59 = vmul.f32 %v251_v55, %v837_v51  ;;  %v231_v60 = vpop.f32.mrb[4].mxu0 }
 0x134   :  { %v272_v61 = vadd.f32 %v264_v56, %v827_v43  ;;  %v266_v62 = vmul.f32 0.044715, %v258_v57  ;;  %v848_v63 = vadd.f32 %v231_v60, %v88_v40  ;;  %v233_v0 = vpop.f32.mrb[5].mxu0 }
 0x135   :  { %v267_v1 = vmul.f32 0.044715, %v259_v59  ;;  %v850_v2 = vadd.f32 %v233_v0, %v92_v41  ;;  %v235_v3 = vpop.f32.mrb[6].mxu0  ;;  %v273_v4 = vadd.f32 %v265_v58, %v829_v45 }
 0x136   :  { %v280_v5 = vmul.f32 0.7978846, %v272_v61  ;;  %v274_v6 = vadd.f32 %v266_v62, %v833_v48  ;;  %v252_v7 = vmul.f32 %v848_v63, %v848_v63  ;;  %v236_v8 = vadd.f32 %v235_v3, %v88_v40  ;;  %v237_v9 = vpop.f32.mrb[7].mxu0 }
 0x137   :  { %v253_v10 = vmul.f32 %v850_v2, %v850_v2  ;;  %v238_v11 = vadd.f32 %v237_v9, %v92_v41  ;;  %v275_v12 = vadd.f32 %v267_v1, %v837_v51  ;;  %v281_v13 = vmul.f32 0.7978846, %v273_v4 }
 0x138   :  { %636 = vtanh.f32 %v280_v5  ;;  %v282_v14 = vmul.f32 0.7978846, %v274_v6  ;;  %v260_v15 = vmul.f32 %v252_v7, %v848_v63  ;;  %v254_v16 = vmul.f32 %v236_v8, %v236_v8 }
 0x139   :  { %v261_v17 = vmul.f32 %v253_v10, %v850_v2  ;;  %v255_v18 = vmul.f32 %v238_v11, %v238_v11  ;;  %v283_v19 = vmul.f32 0.7978846, %v275_v12  ;;  %638 = vtanh.f32 %v281_v13  ;;  %v540_v10 = vld [vmem:[%s891_s4] ss:$0 sm:$0xff]  ;;  %s718_s4 = scalar_lea.vmem %s510_s11, 512 }
 0x13a   :  { %640 = vtanh.f32 %v282_v14  ;;  %v268_v20 = vmul.f32 0.044715, %v260_v15  ;;  %v262_v21 = vmul.f32 %v254_v16, %v236_v8  ;;  %v240_v40 = vmul.f32 0.5, %v827_v43  ;;  %p719_p10 = scmp.ne.s32.totalorder %s510_s11, %s718_s4  ;;  %p724_p12 = scmp.lt.s32.totalorder %s718_s4, %s718_s4 }
 0x13b   :  { %v269_v22 = vmul.f32 0.044715, %v261_v17  ;;  %v263_v23 = vmul.f32 %v255_v18, %v238_v11  ;;  %642 = vtanh.f32 %v283_v19  ;;  %v242_v41 = vmul.f32 0.5, %v833_v48 }
 0x13c   :  { %v276_v24 = vadd.f32 %v268_v20, %v848_v63  ;;  %v270_v25 = vmul.f32 0.044715, %v262_v21  ;;  %v244_v48 = vmul.f32 0.5, %v848_v63  ;;  %v246_v45 = vmul.f32 0.5, %v236_v8  ;;  %p725_p13 = por %p724_p12, %p723_p11 }
 0x13d   :  { %v277_v26 = vadd.f32 %v269_v22, %v850_v2  ;;  %v271_v27 = vmul.f32 0.044715, %v263_v23  ;;  %v245_v51 = vmul.f32 0.5, %v850_v2  ;;  %v247_v62 = vmul.f32 0.5, %v238_v11 }
 0x13e   :  { %v284_v28 = vmul.f32 0.7978846, %v276_v24  ;;  %v278_v29 = vadd.f32 %v270_v25, %v236_v8  ;;  %p726_p0 = pnand %p725_p13, %p719_p10 }
 0x13f   :  { %v285_v30 = vmul.f32 0.7978846, %v277_v26  ;;  %v279_v31 = vadd.f32 %v271_v27, %v238_v11 }
 0x140   :  { %644 = vtanh.f32 %v284_v28  ;;  %v286_v32 = vmul.f32 0.7978846, %v278_v29 }
 0x141   :  { %646 = vtanh.f32 %v285_v30  ;;  %v287_v33 = vmul.f32 0.7978846, %v279_v31 }
 0x142   :  { %v637_v34 = vpop.eup %636  ;;  %648 = vtanh.f32 %v286_v32 }
 0x143   :  { %v639_v35 = vpop.eup %638  ;;  %650 = vtanh.f32 %v287_v33  ;;  %v296_v36 = vadd.f32 1.0, %v637_v34 }
 0x144   :  { %v641_v37 = vpop.eup %640  ;;  %v297_v38 = vadd.f32 1.0, %v639_v35 }
 0x145   :  { %v643_v39 = vpop.eup %642  ;;  %v298_v42 = vadd.f32 1.0, %v641_v37  ;;  %v304_v49 = vmul.f32 %v296_v36, %v240_v40 }
 0x146   :  { %v299_v47 = vadd.f32 1.0, %v643_v39  ;;  %v305_v52 = vmul.f32 %v297_v38, %v241_v44 }
 0x147   :  { %v306_v50 = vmul.f32 %v298_v42, %v242_v41 }
 0x148   :  { %v307_v53 = vmul.f32 %v299_v47, %v243_v46 }
 0x149   :  { %v312_v54 = vpack.c.bf16 %v306_v50, %v304_v49 }
 0x14a   :  { %v645_v55 = vpop.eup %644  ;;  %v313_v56 = vpack.c.bf16 %v307_v53, %v305_v52 }
 0x14b   :  { %v647_v57 = vpop.eup %646  ;;  %v300_v58 = vadd.f32 1.0, %v645_v55 }
 0x14c   :  { %v649_v59 = vpop.eup %648  ;;  %483 = vmatprep.mubr.bf16.mxu1 %v313_v56  ;;  %v301_v43 = vadd.f32 1.0, %v647_v57 }
 0x14d   :  { %v651_v60 = vpop.eup %650  ;;  %484 = vmatmul.mubr.bf16.vlgmr.msra.gmra.mrb[0].mxu1 %v312_v54  ;;  %v302_v61 = vadd.f32 1.0, %v649_v59  ;;  %v308_v1 = vmul.f32 %v300_v58, %v244_v48 }
 0x14e   :  { %v303_v0 = vadd.f32 1.0, %v651_v60  ;;  %v309_v4 = vmul.f32 %v301_v43, %v245_v51 }
 0x14f   :  { %v310_v3 = vmul.f32 %v302_v61, %v246_v45 }
 0x150   :  { %v311_v5 = vmul.f32 %v303_v0, %v247_v62 }
 0x151   :  { %v314_v6 = vpack.c.bf16 %v310_v3, %v308_v1 }
 0x152   :  { %v315_v7 = vpack.c.bf16 %v311_v5, %v309_v4 }
 0x154   :  { %491 = vmatprep.mubr.bf16.mxu1 %v315_v7 }
 0x155   :  { %492 = vmatmul.mubr.bf16.gmra.mrb[4].mxu1 %v314_v6 }
 0x220   :  { %v573_v9 = vpop.f32.mrb[0].mxu1 }
 0x221   :  { %v574_v63 = vpop.f32.mrb[1].mxu1 }
 0x222   :  { %v575_v8 = vadd.f32 %v574_v63, %v573_v9  ;;  %v576_v12 = vpop.f32.mrb[2].mxu1 }
 0x223   :  { %v577_v13 = vpop.f32.mrb[3].mxu1 }
 0x224   :  { %v486_v2 = vadd.f32 %v575_v8, %v540_v10  ;;  %v578_v11 = vadd.f32 %v577_v13, %v576_v12 }
 0x226   :  { %500 = vst [vmem:[#allocation8] sm:$0xff] %v486_v2  ;;  %v489_v14 = vadd.f32 %v578_v11, %v540_v10 }
 0x228   :  { %501 = vst [vmem:[#allocation8 + $0x8] sm:$0xff] %v489_v14  ;;  %v579_v15 = vpop.f32.mrb[4].mxu1 }
 0x229   :  { %v580_v16 = vpop.f32.mrb[5].mxu1 }
 0x22a   :  { %v581_v17 = vadd.f32 %v580_v16, %v579_v15  ;;  %v582_v18 = vpop.f32.mrb[6].mxu1 }
 0x22b   :  { %v583_v19 = vpop.f32.mrb[7].mxu1 }
 0x22c   :  { %v494_v20 = vadd.f32 %v581_v17, %v540_v10  ;;  %v584_v21 = vadd.f32 %v583_v19, %v582_v18 }
 0x22e   :  { %502 = vst [vmem:[#allocation8 + $0x10] sm:$0xff] %v494_v20  ;;  %v497_v22 = vadd.f32 %v584_v21, %v540_v10 }
 0x230   :  { %503 = vst [vmem:[#allocation8 + $0x18] sm:$0xff] %v497_v22 }
 0x231   :  { %729 = shalt.err (!%p726_p0)
}
 0x232   :  { %s730_s14 = scalar_lea.hbm %s892_s5, 512 }
 0x233   :  { %p731_p1 = scmp.ne.s32.totalorder %s892_s5, %s730_s14  ;;  %p734_p2 = scmp.lt.u32.totalorder %s730_s14, %s892_s5 }
 0x235   :  { %p736_p3 = pnand %p734_p2, %p731_p1 }
 0x237   :  { %739 = shalt.err (!%p736_p3)
}
 0x238   :  { %515 = dma.vmem_to_hbm [thread:$0]  %s510_s11, 512, %s892_s5, [#allocation4], %s747_s28, %s747_s28, %s748_s29  }
 0x239   :  { %744 = dma.done.wait [#allocation4], 512  }
 0x23a   :  { %745 = vsyncadd [#allocation4], 4294966784 }
 0x23b   :  { %519 = vsyncpa [#allocation3], 1 }
 0x23c   :  { %520 = vsyncpa [#allocation6], 1 }
 0x23d   :  { %521 = vsyncpa [#allocation4], 1 }

</bundles_post_ra>
